<compile_context>
chip_gen: v6e
topology: v6e:2x2x1
jax: 0.10.0
libtpu: 0.0.40
codegen_flags: <defaults>
</compile_context>

<pallas_src>
import math

import jax
import jax.numpy as jnp
from jax.experimental import pallas as pl
from jax.experimental.pallas import tpu as pltpu


def _round_up(v, m):
    return ((v + m - 1) // m) * m


def _fuse_weights(conv_w, ds_w, cin_pad, cout_pad, dtype):
    """(C_out,C_in,K) conv taps + (C_out,C_in) 1x1 downsample -> (2*cout_pad, K*cin_pad).

    Row block 0 = conv output channels, row block 1 = downsample output channels.
    Column block t multiplies the input shifted right by (K-1-t)*dilation; the
    downsample weights sit in the last (unshifted) column block.
    """
    c_out, c_in, k = conv_w.shape
    w = jnp.pad(conv_w.astype(jnp.float32),
                ((0, cout_pad - c_out), (0, cin_pad - c_in), (0, 0)))
    taps = jnp.concatenate([w[:, :, t] for t in range(k)], axis=1)        # (cout_pad, K*cin_pad)
    ds = jnp.pad(ds_w.astype(jnp.float32),
                 ((0, cout_pad - c_out), (0, cin_pad - c_in)))
    ds_row = jnp.concatenate(
        [jnp.zeros((cout_pad, (k - 1) * cin_pad), jnp.float32), ds], axis=1)
    return jnp.concatenate([taps, ds_row], axis=0).astype(dtype)          # (2*cout_pad, K*cin_pad)


def _pad_vec(v, n):
    return jnp.pad(v.astype(jnp.float32), (0, n - v.shape[0]))


def temporal_conv_net(x, params, *, matmul_dtype=jnp.bfloat16, target_lanes=4096):
    """x: (N, C_in, L) float32 -> (N, C1, L); matches TemporalConvNet.forward()."""
    N, Cin, L = x.shape
    w1_t, w2_t = params["w1"], params["w2"]
    C0, _, K = w1_t.shape
    C1 = w2_t.shape[0]
    eps = 1e-5
    f32 = jnp.float32
    is_bf16 = jnp.dtype(matmul_dtype) == jnp.dtype(jnp.bfloat16)

    # ---------------- layout / tiling ----------------
    align = 16 if is_bf16 else 8                       # bf16 sublane packing -> 16-aligned channels
    Cin_p = _round_up(Cin, align)
    C0_p = _round_up(C0, align)
    C1_p = _round_up(C1, align)

    NL = N * L
    base = L * 128 // math.gcd(L, 128)                 # lcm(L,128): tiles hold whole length-L segments
    # crude per-lane live-VMEM estimate (f32 bytes): streamed blocks (double-buffered) +
    # K-stacked matmul operand + conv outputs; used to bound the tile for v7x (64 MiB VMEM).
    per_lane = 4 * ((K + 5) * max(Cin_p, C0_p, C1_p) + 4 * max(C0_p, C1_p))
    budget = 24 * 2**20
    max_lanes = max(base, (budget // per_lane) // base * base)
    tile = min(base * max(1, target_lanes // base), max_lanes, _round_up(NL, base))
    tile = max(base, (tile // base) * base)
    NLp = _round_up(NL, tile)
    nt = NLp // tile
    inv_cnt = 1.0 / float(NL)

    # channel-major, lane-flattened activations (the only wrapper-side transpose/pad).
    xf = jnp.pad(jnp.transpose(x, (1, 0, 2)).reshape(Cin, NL).astype(f32),
                 ((0, Cin_p - Cin), (0, NLp - NL)))

    w1_full = _fuse_weights(w1_t, params["wd0"][:, :, 0], Cin_p, C0_p, matmul_dtype)
    w2_full = _fuse_weights(w2_t, params["wd1"][:, :, 0], C0_p, C1_p, matmul_dtype)
    g1, b1 = _pad_vec(params["g1"], C0_p), _pad_vec(params["b1"], C0_p)
    g2, b2 = _pad_vec(params["g2"], C1_p), _pad_vec(params["b2"], C1_p)
    bd0 = _pad_vec(params["bd0"], C0_p).reshape(C0_p, 1)
    bd1 = _pad_vec(params["bd1"], C1_p).reshape(C1_p, 1)

    # ---------------- kernels ----------------
    def shift_stack(v, p, dil):
        # v: (C_p, tile) matmul dtype; p: (1, tile) position within its length-L segment.
        # Causal right-shift by s lanes inside each segment (zeros shifted in); segments
        # never straddle tiles because tile % L == 0, so roll wrap lanes are masked off.
        def shifted(s):
            if s == 0:
                return v
            r = pltpu.roll(v, s, 1)                    # r[:, l] = v[:, l - s]
            return jnp.where(p >= s, r, 0.0)
        # TODO(synk): for very wide channels on v7x, switch to K accumulated matmuls to
        # drop the K*C_p*tile staging buffer (only worthwhile once C_in >= ~64).
        return jnp.concatenate([shifted((K - 1 - t) * dil) for t in range(K)], axis=0)

    def conv1_kernel(x_ref, w_ref, y_ref, s1_ref, s2_ref):
        p = jax.lax.broadcasted_iota(jnp.int32, (1, tile), 1) % L
        xs = shift_stack(x_ref[...].astype(matmul_dtype), p, 1)
        y = jnp.dot(w_ref[...], xs, preferred_element_type=f32)      # [conv1 ; wd0 @ x]
        y_ref[...] = y
        conv = y[:C0_p]                                # padded lanes are exactly 0 -> unmasked stats
        s1_ref[...] = jnp.sum(conv, axis=1, keepdims=True)
        s2_ref[...] = jnp.sum(conv * conv, axis=1, keepdims=True)

    def conv2_kernel(y1_ref, sc_ref, sh_ref, bd_ref, w_ref, y_ref, s1_ref, s2_ref):
        lane = jax.lax.broadcasted_iota(jnp.int32, (1, tile), 1)
        p = lane % L
        valid = (pl.program_id(0) * tile + lane) < NL
        y1 = y1_ref[...]
        xb = jnp.maximum(y1[:C0_p] * sc_ref[...] + sh_ref[...], 0.0)  # BN1 + ReLU (f32)
        out0 = jnp.maximum(xb + y1[C0_p:] + bd_ref[...], 0.0)         # + downsample0 residual, ReLU
        out0 = jnp.where(valid, out0, 0.0)             # keep pad lanes zero (stats / shift safety)
        xs = shift_stack(out0.astype(matmul_dtype), p, 2)
        y = jnp.dot(w_ref[...], xs, preferred_element_type=f32)      # [conv2 ; wd1 @ out0]
        y_ref[...] = y
        conv = y[:C1_p]
        s1_ref[...] = jnp.sum(conv, axis=1, keepdims=True)
        s2_ref[...] = jnp.sum(conv * conv, axis=1, keepdims=True)

    def bn2_kernel(y2_ref, sc_ref, sh_ref, bd_ref, out_ref):
        y2 = y2_ref[...]
        xb = jnp.maximum(y2[:C1_p] * sc_ref[...] + sh_ref[...], 0.0)  # BN2 + ReLU
        out_ref[...] = jnp.maximum(xb + y2[C1_p:] + bd_ref[...], 0.0).astype(out_ref.dtype)

    # ---------------- specs / compiler params ----------------
    def lane_spec(rows):
        return pl.BlockSpec((rows, tile), lambda i: (0, i))

    def full_spec(shape):
        return pl.BlockSpec(shape, lambda i: (0,) * len(shape))

    def stat_spec(rows):
        return pl.BlockSpec((None, rows, 1), lambda i: (i, 0, 0))

    cp = pltpu.CompilerParams(
        dimension_semantics=("parallel",),             # v7x megacore shards the lane tiles
        vmem_limit_bytes=int(min(64 * 2**20, max(32 * 2**20, 4 * per_lane * tile))))

    wbytes = jnp.dtype(matmul_dtype).itemsize
    cost1 = pl.CostEstimate(
        flops=2 * (2 * C0_p) * (K * Cin_p) * NLp, transcendentals=0,
        bytes_accessed=4 * NLp * (Cin_p + 2 * C0_p) + wbytes * 2 * C0_p * K * Cin_p)
    cost2 = pl.CostEstimate(
        flops=2 * (2 * C1_p) * (K * C0_p) * NLp + 8 * C0_p * NLp, transcendentals=0,
        bytes_accessed=4 * NLp * (2 * C0_p + 2 * C1_p) + wbytes * 2 * C1_p * K * C0_p)
    cost3 = pl.CostEstimate(
        flops=6 * C1_p * NLp, transcendentals=0,
        bytes_accessed=4 * NLp * (2 * C1_p + C1_p))

    def bn_affine(s1, s2, g, b):
        # Tiny per-channel math done once in the wrapper: BN apply becomes scale*x + shift.
        mean = s1 * inv_cnt                                        # (C_p, 1)
        var = jnp.maximum(s2 * inv_cnt - mean * mean, 0.0)         # biased batch variance
        scale = g.reshape(-1, 1) * jax.lax.rsqrt(var + eps)
        return scale, b.reshape(-1, 1) - mean * scale

    # ---- pass 1: conv1 + downsample0 (fused matmul), partial BN1 stats ----
    y1, s1a, s2a = pl.pallas_call(
        conv1_kernel,
        grid=(nt,),
        in_specs=[lane_spec(Cin_p), full_spec((2 * C0_p, K * Cin_p))],
        out_specs=[lane_spec(2 * C0_p), stat_spec(C0_p), stat_spec(C0_p)],
        out_shape=[jax.ShapeDtypeStruct((2 * C0_p, NLp), f32),
                   jax.ShapeDtypeStruct((nt, C0_p, 1), f32),
                   jax.ShapeDtypeStruct((nt, C0_p, 1), f32)],
        compiler_params=cp, cost_estimate=cost1,
    )(xf, w1_full)
    sc1, sh1 = bn_affine(jnp.sum(s1a, axis=0), jnp.sum(s2a, axis=0), g1, b1)

    # ---- pass 2: apply BN1 + residual -> out0; conv2 + downsample1, partial BN2 stats ----
    y2, s1b, s2b = pl.pallas_call(
        conv2_kernel,
        grid=(nt,),
        in_specs=[lane_spec(2 * C0_p), full_spec((C0_p, 1)), full_spec((C0_p, 1)),
                  full_spec((C0_p, 1)), full_spec((2 * C1_p, K * C0_p))],
        out_specs=[lane_spec(2 * C1_p), stat_spec(C1_p), stat_spec(C1_p)],
        out_shape=[jax.ShapeDtypeStruct((2 * C1_p, NLp), f32),
                   jax.ShapeDtypeStruct((nt, C1_p, 1), f32),
                   jax.ShapeDtypeStruct((nt, C1_p, 1), f32)],
        compiler_params=cp, cost_estimate=cost2,
    )(y1, sc1, sh1, bd0, w2_full)
    sc2, sh2 = bn_affine(jnp.sum(s1b, axis=0), jnp.sum(s2b, axis=0), g2, b2)

    # ---- pass 3: apply BN2 + residual -> output ----
    out_flat = pl.pallas_call(
        bn2_kernel,
        grid=(nt,),
        in_specs=[lane_spec(2 * C1_p), full_spec((C1_p, 1)), full_spec((C1_p, 1)),
                  full_spec((C1_p, 1))],
        out_specs=lane_spec(C1_p),
        out_shape=jax.ShapeDtypeStruct((C1_p, NLp), x.dtype),
        compiler_params=cp, cost_estimate=cost3,
    )(y2, sc2, sh2, bd1)

    return jnp.transpose(out_flat[:C1, :NL].reshape(C1, N, L), (1, 0, 2))


def tcn_reference(x, params):
    """Pure-JAX reference mirroring TemporalConvNet.forward (training-mode BN)."""
    N, Cin, L = x.shape
    w1, w2 = params["w1"], params["w2"]
    eps = 1e-5

    def causal_conv(v, w, dil):
        k = w.shape[2]
        pad = (k - 1) * dil
        vp = jnp.pad(v, ((0, 0), (0, 0), (pad, 0)))
        out = jnp.zeros((v.shape[0], w.shape[0], L), jnp.float32)
        for t in range(k):
            out = out + jnp.einsum("oc,ncl->nol", w[:, :, t], vp[:, :, t * dil:t * dil + L])
        return out

    def bn_relu(v, g, b):
        mean = v.mean(axis=(0, 2), keepdims=True)
        var = ((v - mean) ** 2).mean(axis=(0, 2), keepdims=True)
        y = (v - mean) * jax.lax.rsqrt(var + eps) * g.reshape(1, -1, 1) + b.reshape(1, -1, 1)
        return jax.nn.relu(y)

    x0 = bn_relu(causal_conv(x, w1, 1), params["g1"], params["b1"])
    res0 = jnp.einsum("oc,ncl->nol", params["wd0"][:, :, 0], x) + params["bd0"].reshape(1, -1, 1)
    out0 = jax.nn.relu(x0 + res0)
    x1 = bn_relu(causal_conv(out0, w2, 2), params["g2"], params["b2"])
    res1 = jnp.einsum("oc,ncl->nol", params["wd1"][:, :, 0], out0) + params["bd1"].reshape(1, -1, 1)
    return jax.nn.relu(x1 + res1)


if __name__ == "__main__":
    key = jax.random.PRNGKey(0)
    N, Cin, L = 2, 4, 16
    K = 3                                    # kernel_size
    num_channels = [8, 16]
    C0 = num_channels[1]                     # out_channels0 (module uses num_channels[1])
    C1 = num_channels[1]                     # out_channels1

    ks = jax.random.split(key, 8)
    params = dict(
        # conv_block1: Conv1d(Cin, C0, K, bias=False, dilation=1)
        w1=jax.random.normal(ks[0], (C0, Cin, K), jnp.float32) * 0.3,
        g1=jnp.ones((C0,), jnp.float32),          # BatchNorm1d(C0) weight
        b1=jnp.zeros((C0,), jnp.float32),         # BatchNorm1d(C0) bias
        # downsample0: Conv1d(Cin, C0, 1)   (Cin != C0)
        wd0=jax.random.normal(ks[1], (C0, Cin, 1), jnp.float32) * 0.3,
        bd0=jax.random.normal(ks[2], (C0,), jnp.float32) * 0.1,
        # conv_block2: Conv1d(C0, C1, K, bias=False, dilation=2)
        w2=jax.random.normal(ks[3], (C1, C0, K), jnp.float32) * 0.3,
        g2=jnp.ones((C1,), jnp.float32),          # BatchNorm1d(C1) weight
        b2=jnp.zeros((C1,), jnp.float32),         # BatchNorm1d(C1) bias
        # downsample1: Conv1d(C1, C1, 1)    (num_channels[0] != num_channels[1])
        wd1=jax.random.normal(ks[4], (C1, C1, 1), jnp.float32) * 0.3,
        bd1=jax.random.normal(ks[5], (C1,), jnp.float32) * 0.1,
    )
    x = jax.random.normal(ks[6], (N, Cin, L), jnp.float32)

    ref = tcn_reference(x, params)

    # f32 MXU path: reference numerics.
    out_f32 = temporal_conv_net(x, params, matmul_dtype=jnp.float32)
    jax.block_until_ready(out_f32)
    assert out_f32.shape == (N, C1, L), out_f32.shape
    err32 = float(jnp.max(jnp.abs(out_f32 - ref)))
    assert err32 < 2e-2, f"f32 max abs error vs reference: {err32}"

    # default bf16 MXU path (f32 accumulation / elementwise): looser tolerance.
    out_bf16 = temporal_conv_net(x, params)
    jax.block_until_ready(out_bf16)
    assert out_bf16.shape == (N, C1, L), out_bf16.shape
    err16 = float(jnp.max(jnp.abs(out_bf16 - ref)))
    assert err16 < 2.5e-1, f"bf16 max abs error vs reference: {err16}"

    print("KERNEL_OK")
</pallas_src>

<mosaic_0001>
module attributes {stable_mosaic.version = 11 : i64} {
  func.func @conv1_kernel(%arg0: i32, %arg1: memref<8x128xf32, #tpu.memory_space<vmem>>, %arg2: memref<32x24xf32, #tpu.memory_space<vmem>>, %arg3: memref<32x128xf32, #tpu.memory_space<vmem>>, %arg4: memref<1x16x1xf32, #tpu.memory_space<vmem>>, %arg5: memref<1x16x1xf32, #tpu.memory_space<vmem>>) attributes {dimension_semantics = [#tpu.dimension_semantics<parallel>], iteration_bounds = array<i64: 1>, scalar_prefetch = 0 : i64, scratch_operands = 0 : i64, tpu.core_type = #tpu.core_type<tc>, window_params = [{transform_indices = @transform_0, window_bounds = array<i64: 8, 128>}, {pipeline_mode = #tpu.pipeline_mode<synchronous>, transform_indices = @transform_1, window_bounds = array<i64: 32, 24>}, {transform_indices = @transform_2, window_bounds = array<i64: 32, 128>}, {transform_indices = @transform_3, window_bounds = array<i64: 1, 16, 1>}, {transform_indices = @transform_4, window_bounds = array<i64: 1, 16, 1>}]} {
    %0 = tpu.iota {dimensions = array<i32: 1>} : vector<1x128xi32>
    %c16_i32 = arith.constant 16 : i32
    %c0_i32 = arith.constant 0 : i32
    %1 = arith.cmpi eq, %c16_i32, %c0_i32 : i32
    %c1_i32 = arith.constant 1 : i32
    %2 = arith.select %1, %c1_i32, %c16_i32 : i32
    %3 = vector.broadcast %2 : i32 to vector<1x128xi32>
    %4 = arith.remsi %0, %3 : vector<1x128xi32>
    %c0_i32_0 = arith.constant 0 : i32
    %5 = vector.broadcast %c0_i32_0 : i32 to vector<1x128xi32>
    %6 = arith.cmpi ne, %4, %5 : vector<1x128xi32>
    %c0_i32_1 = arith.constant 0 : i32
    %7 = vector.broadcast %c0_i32_1 : i32 to vector<1x128xi32>
    %8 = arith.cmpi slt, %4, %7 : vector<1x128xi32>
    %c0_i32_2 = arith.constant 0 : i32
    %9 = arith.cmpi slt, %2, %c0_i32_2 : i32
    %10 = vector.broadcast %9 : i1 to vector<1x128xi1>
    %11 = vector.broadcast %10 : vector<1x128xi1> to vector<1x128xi1>
    %12 = arith.xori %8, %11 : vector<1x128xi1>
    %13 = arith.andi %12, %6 : vector<1x128xi1>
    %14 = vector.broadcast %2 : i32 to vector<1x128xi32>
    %15 = arith.addi %4, %14 : vector<1x128xi32>
    %16 = arith.select %13, %15, %4 : vector<1x128xi1>, vector<1x128xi32>
    %c0 = arith.constant 0 : index
    %c0_3 = arith.constant 0 : index
    %17 = vector.load %arg1[%c0, %c0_3] : memref<8x128xf32, #tpu.memory_space<vmem>>, vector<8x128xf32>
    %c2_i32 = arith.constant 2 : i32
    %18 = tpu.dynamic_rotate %17 by %c2_i32 dim 1 : vector<8x128xf32>, i32 -> vector<8x128xf32>
    %c2_i32_4 = arith.constant 2 : i32
    %19 = vector.broadcast %c2_i32_4 : i32 to vector<1x128xi32>
    %20 = arith.cmpi sge, %16, %19 : vector<1x128xi32>
    %cst = arith.constant 0.000000e+00 : f32
    %21 = vector.shape_cast %20 : vector<1x128xi1> to vector<1x128xi1>
    %22 = vector.broadcast %21 : vector<1x128xi1> to vector<8x128xi1>
    %23 = vector.broadcast %cst : f32 to vector<8x128xf32>
    %24 = arith.select %22, %18, %23 : vector<8x128xi1>, vector<8x128xf32>
    %c1_i32_5 = arith.constant 1 : i32
    %25 = tpu.dynamic_rotate %17 by %c1_i32_5 dim 1 : vector<8x128xf32>, i32 -> vector<8x128xf32>
    %c1_i32_6 = arith.constant 1 : i32
    %26 = vector.broadcast %c1_i32_6 : i32 to vector<1x128xi32>
    %27 = arith.cmpi sge, %16, %26 : vector<1x128xi32>
    %cst_7 = arith.constant 0.000000e+00 : f32
    %28 = vector.shape_cast %27 : vector<1x128xi1> to vector<1x128xi1>
    %29 = vector.broadcast %28 : vector<1x128xi1> to vector<8x128xi1>
    %30 = vector.broadcast %cst_7 : f32 to vector<8x128xf32>
    %31 = arith.select %29, %25, %30 : vector<8x128xi1>, vector<8x128xf32>
    %32 = tpu.concatenate %24, %31, %17 in 0 : vector<8x128xf32>, vector<8x128xf32>, vector<8x128xf32> -> vector<24x128xf32>
    %c0_8 = arith.constant 0 : index
    %c0_9 = arith.constant 0 : index
    %33 = vector.load %arg2[%c0_8, %c0_9] : memref<32x24xf32, #tpu.memory_space<vmem>>, vector<32x24xf32>
    %cst_10 = arith.constant dense<0.000000e+00> : vector<32x128xf32>
    %34 = tpu.matmul %33, %32, %cst_10 {dimension_numbers = #tpu.dot_dimension_numbers<[1], [0], [0], [1], [0, 0, 1, 1], [], []>} : vector<32x24xf32>, vector<24x128xf32>, vector<32x128xf32> -> vector<32x128xf32>
    %c0_11 = arith.constant 0 : index
    %c0_12 = arith.constant 0 : index
    %35 = vector.load %arg3[%c0_11, %c0_12] : memref<32x128xf32, #tpu.memory_space<vmem>>, vector<32x128xf32>
    tpu.vector_store %arg3[%c0_11, %c0_12], %34 {strides = array<i32>} : memref<32x128xf32, #tpu.memory_space<vmem>>, vector<32x128xf32>,
    %36 = vector.extract_strided_slice %34 {offsets = [0, 0], sizes = [16, 128], strides = [1, 1]} : vector<32x128xf32> to vector<16x128xf32>
    %cst_13 = arith.constant dense<0.000000e+00> : vector<16xf32>
    %37 = vector.multi_reduction <add>, %36, %cst_13 [1] : vector<16x128xf32> to vector<16xf32>
    %38 = vector.shape_cast %37 : vector<16xf32> to vector<16x1xf32>
    %c0_14 = arith.constant 0 : index
    %c0_15 = arith.constant 0 : index
    %c0_16 = arith.constant 0 : index
    %39 = vector.load %arg4[%c0_14, %c0_15, %c0_16] : memref<1x16x1xf32, #tpu.memory_space<vmem>>, vector<1x16x1xf32>
    %40 = vector.shape_cast %39 : vector<1x16x1xf32> to vector<16x1xf32>
    %41 = vector.shape_cast %38 : vector<16x1xf32> to vector<1x16x1xf32>
    tpu.vector_store %arg4[%c0_14, %c0_15, %c0_16], %41 {strides = array<i32>} : memref<1x16x1xf32, #tpu.memory_space<vmem>>, vector<1x16x1xf32>,
    %42 = arith.mulf %36, %36 : vector<16x128xf32>
    %cst_17 = arith.constant dense<0.000000e+00> : vector<16xf32>
    %43 = vector.multi_reduction <add>, %42, %cst_17 [1] : vector<16x128xf32> to vector<16xf32>
    %44 = vector.shape_cast %43 : vector<16xf32> to vector<16x1xf32>
    %c0_18 = arith.constant 0 : index
    %c0_19 = arith.constant 0 : index
    %c0_20 = arith.constant 0 : index
    %45 = vector.load %arg5[%c0_18, %c0_19, %c0_20] : memref<1x16x1xf32, #tpu.memory_space<vmem>>, vector<1x16x1xf32>
    %46 = vector.shape_cast %45 : vector<1x16x1xf32> to vector<16x1xf32>
    %47 = vector.shape_cast %44 : vector<16x1xf32> to vector<1x16x1xf32>
    tpu.vector_store %arg5[%c0_18, %c0_19, %c0_20], %47 {strides = array<i32>} : memref<1x16x1xf32, #tpu.memory_space<vmem>>, vector<1x16x1xf32>,
    return
  }
  func.func @transform_0(%arg0: i32) -> (i32, i32) {
    %c0_i32 = arith.constant 0 : i32
    %c0_i32_0 = arith.constant 0 : i32
    return %c0_i32, %arg0 : i32, i32
  }
  func.func @transform_1(%arg0: i32) -> (i32, i32) {
    %c0_i32 = arith.constant 0 : i32
    %c0_i32_0 = arith.constant 0 : i32
    %c0_i32_1 = arith.constant 0 : i32
    return %c0_i32, %c0_i32_0 : i32, i32
  }
  func.func @transform_2(%arg0: i32) -> (i32, i32) {
    %c0_i32 = arith.constant 0 : i32
    %c0_i32_0 = arith.constant 0 : i32
    return %c0_i32, %arg0 : i32, i32
  }
  func.func @transform_3(%arg0: i32) -> (i32, i32, i32) {
    %c0_i32 = arith.constant 0 : i32
    %c0_i32_0 = arith.constant 0 : i32
    %c0_i32_1 = arith.constant 0 : i32
    return %arg0, %c0_i32, %c0_i32_0 : i32, i32, i32
  }
  func.func @transform_4(%arg0: i32) -> (i32, i32, i32) {
    %c0_i32 = arith.constant 0 : i32
    %c0_i32_0 = arith.constant 0 : i32
    %c0_i32_1 = arith.constant 0 : i32
    return %arg0, %c0_i32, %c0_i32_0 : i32, i32, i32
  }
}

</mosaic_0001>

<bundles_post_ra>
// kernel: tpu_custom_call.1
= control target key start
LH: loop header
LB: loop body
LE: loop exit
PB: predicated region body
PF: predicated region fallthrough
CT: control target
= control target key end

     0   :  { %vm46_vm0 = vcmask 195584   ;;  %s245_s19 = smov 1   ;;  %s309_s0 = inlined_call_operand.vmem [shape: f32[8,128], index: 0, kind: input, shape index: {}]   ;;  %s310_s1 = inlined_call_operand.vmem [shape: f32[32,24], index: 1, kind: input, shape index: {}]   ;;  %s311_s2 = inlined_call_operand.hbm [shape: f32[32,128], index: 2, kind: output, shape index: {0}]   ;;  %s312_s3 = inlined_call_operand.vmem [shape: f32[1,16,1], index: 3, kind: output, shape index: {1}]   ;;  %s313_s4 = inlined_call_operand.vmem [shape: f32[1,16,1], index: 4, kind: output, shape index: {2}]  }
   0x1   :  { %v29_v0 = vld [vmem:[%s309_s0] sm:$0xff]  ;;  %v44_v2 = vld [vmem:[%s310_s1 + $0x10] sm:$0xff] }
   0x2   :  { %v42_v1 = vld [vmem:[%s310_s1] sm:$0xff]  ;;  %36 = vrot.lane.b32.xlu0 %v29_v0, %s245_s19  ;;  %200 = vmatprep.subr.mxu0 %v29_v0 }
   0x3   :  { %10 = vsyncpa [#allocation3], 0  ;;  %212 = vmatprep.subr.mxu1 %v29_v0  ;;  %201 = vmatpush3.msra.mxu0 %v29_v0  ;;  %s246_s0 = smov 2   ;;  %v15_v3 = vlaneseq  ;;  %v43_v8 = vld [vmem:[%s310_s1 + $0x8] sm:$0xff]  ;;  %v45_v9 = vld [vmem:[%s310_s1 + $0x18] sm:$0xff]  ;;  %s247_s1 = smov [#allocation2]  }
   0x4   :  { %215 = vmatpush3.msra.mxu1 %v29_v0  ;;  %206 = vmatprep.mubr.msk.f32.mxu0 %vm46_vm0, %v42_v1  ;;  %s168_s26 = sshll.u32 %s247_s1, 4  ;;  %s169_s26 = int_to_ptr.vmem [resolvable:$true] %s168_s26 }
   0x5   :  { %209 = vmatprep.mubr.msk.f32.mxu1 %vm46_vm0, %v44_v2  ;;  %v16_v4 = vand.u32 127, %v15_v3  ;;  %s223_s27 = scalar_lea.vmem %s169_s26, 512  ;;  %p228_p1 = scmp.lt.s32.totalorder %s169_s26, %s169_s26 }
   0x6   :  { %30 = vrot.lane.b32.xlu0 %v29_v0, %s246_s0  ;;  %p224_p0 = scmp.ne.s32.totalorder %s169_s26, %s223_s27  ;;  %p229_p2 = scmp.lt.s32.totalorder %s223_s27, %s223_s27 }
   0x7   :  { %v21_v5 = vand.u32 15, %v16_v4 }
   0x8   :  { %p230_p3 = por %p229_p2, %p228_p1 }
   0x9   :  { %vm38_vm1 = vcmp.ge.s32.totalorder %v21_v5, 1  ;;  %vm32_vm2 = vcmp.ge.s32.totalorder %v21_v5, 2 }
   0xa   :  { %p231_p4 = pnand %p230_p3, %p224_p0 }
  0x74   :  { %v37_v6 = vpop.permute.xlu0 %36 }
  0x75   :  { %202 = vmatprep.subr.msk.mxu0 %vm38_vm1, %v37_v6  ;;  %213 = vmatprep.subr.msk.mxu1 %vm38_vm1, %v37_v6 }
  0x76   :  { %203 = vmatpush3.msk.msra.mxu0 %vm38_vm1, %v37_v6  ;;  %216 = vmatpush3.msk.msra.mxu1 %vm38_vm1, %v37_v6 }
  0x78   :  { %v31_v7 = vpop.permute.xlu0 %30 }
  0x79   :  { %204 = vmatprep.subr.msk.mxu0 %vm32_vm2, %v31_v7  ;;  %214 = vmatprep.subr.msk.mxu1 %vm32_vm2, %v31_v7 }
  0x7a   :  { %205 = vmatpush3.msk.msra.mxu0 %vm32_vm2, %v31_v7  ;;  %217 = vmatpush3.msk.msra.mxu1 %vm32_vm2, %v31_v7 }
  0x7b   :  { %207 = vmatmul.mubr.msk.f32.vlgmr.msra.gmra.mxu0 %vm46_vm0, %v43_v8  ;;  %210 = vmatmul.mubr.msk.f32.vlgmr.msra.gmra.mxu1 %vm46_vm0, %v45_v9 }
 0x13b   :  { %v208_v10 = vpop.f32.mrf.mxu0  ;;  %v211_v14 = vpop.f32.mrf.mxu1 }
 0x13c   :  { %145 = vst [vmem:[#allocation2 + $0x8] sm:$0xff] %v208_v10  ;;  %150 = vadd.xlane.f32.xlu1 %v208_v10  ;;  %v156_v13 = vmul.f32 %v208_v10, %v208_v10  ;;  %147 = vst [vmem:[#allocation2 + $0x18] sm:$0xff] %v211_v14 }
 0x13d   :  { %v125_v11 = vpop.f32.mrf.mxu0  ;;  %v135_v15 = vpop.f32.mrf.mxu1 }
 0x13e   :  { %144 = vst [vmem:[#allocation2] sm:$0xff] %v125_v11  ;;  %v155_v12 = vmul.f32 %v125_v11, %v125_v11  ;;  %146 = vst [vmem:[#allocation2 + $0x10] sm:$0xff] %v135_v15 }
 0x140   :  { %148 = vadd.xlane.f32.xlu1 %v125_v11  ;;  %157 = vadd.xlane.f32.xlu0 %v155_v12 }
 0x144   :  { %159 = vadd.xlane.f32.xlu1 %v156_v13 }
 0x145   :  { %234 = shalt.err (!%p231_p4)
}
 0x146   :  { %s248_s28 = smov 128   ;;  %s249_s29 = smov 8   ;;  %vm152_vm3 = vcmask 7168  }
 0x147   :  { %174 = dma.vmem_to_hbm [thread:$0]  %s169_s26, 512, %s311_s2, [#allocation3], %s248_s28, %s248_s28, %s249_s29  }
 0x1c5   :  { %v151_v16 = vpop.xlane.xlu1 %150 }
 0x1c6   :  { %154 = vst.msk [vmem:[%s312_s3 + $0x8] sm:$0xff] %vm152_vm3, %v151_v16 }
 0x1c9   :  { %v149_v17 = vpop.xlane.xlu1 %148  ;;  %v158_v18 = vpop.xlane.xlu0 %157 }
 0x1ca   :  { %153 = vst.msk [vmem:[%s312_s3] sm:$0xff] %vm152_vm3, %v149_v17  ;;  %161 = vst.msk [vmem:[%s313_s4] sm:$0xff] %vm152_vm3, %v158_v18 }
 0x1cd   :  { %v160_v19 = vpop.xlane.xlu1 %159 }
 0x1ce   :  { %162 = vst.msk [vmem:[%s313_s4 + $0x8] sm:$0xff] %vm152_vm3, %v160_v19 }
 0x1cf   :  { %243 = dma.done.wait [#allocation3], 512  }
 0x1d0   :  { %244 = vsyncadd [#allocation3], 4294966784 }
 0x1d1   :  { %186 = vsyncpa [#allocation3], 1 }

</bundles_post_ra>
